<compile_context>
chip_gen: v7x
topology: tpu7x:2x2x1
jax: 0.10.0
libtpu: 0.0.40
codegen_flags: <defaults>
</compile_context>

<pallas_src>
import functools

import jax
import jax.numpy as jnp
from jax.experimental import pallas as pl
from jax.experimental.pallas import tpu as pltpu

LANE = 128
IN_F, HID, OUT_F = 3, 10, 1


def mlp_kernel(w1_ref, b1_ref, w2_ref, b2_ref, x_ref, o_ref):
    # x_ref: (3, TILE_ROWS, 128) VMEM block (batch on lanes -> lane-dense)
    # o_ref: (TILE_ROWS, 128)    VMEM block
    # Weights arrive PRE-FOLDED for the exact identity
    #   sigmoid(z) = 0.5 * tanh(0.5 * z) + 0.5
    # so each activation is one EUP tanh (no exp + reciprocal).
    x0 = x_ref[0]
    x1 = x_ref[1]
    x2 = x_ref[2]

    # z = b2' + sum_j w2'[j] * tanh(b1'[j] + sum_k w1'[k,j] * x_k)
    # out = 0.5 * tanh(0.5 * z) + 0.5
    y = jnp.full(o_ref.shape, b2_ref[0], dtype=jnp.float32)
    for j in range(HID):
        h = (x0 * w1_ref[0, j]
             + x1 * w1_ref[1, j]
             + x2 * w1_ref[2, j]
             + b1_ref[j])
        y = y + w2_ref[j] * jnp.tanh(h)

    o_ref[...] = (0.5 * jnp.tanh(0.5 * y) + 0.5).astype(o_ref.dtype)


@functools.partial(jax.jit, static_argnames=("tile_rows",))
def _mlp_forward_impl(x, w1, b1, w2, b2, *, tile_rows):
    B = x.shape[0]

    # ---- fold the sigmoid->tanh 0.5 factors into the parameters ----
    w2f = w2.reshape(-1).astype(jnp.float32)
    w1p = 0.5 * w1.astype(jnp.float32)              # (3, 10)
    b1p = 0.5 * b1.astype(jnp.float32)              # (10,)
    w2p = 0.5 * w2f                                 # (10,)
    b2p = b2.reshape(-1).astype(jnp.float32) + 0.5 * jnp.sum(w2f)   # (1,)

    # ---- lane-dense layout plumbing (fused under jit) ----
    n_rows = max(pl.cdiv(B, LANE), 1)               # 128 batch elems per row
    tr = max(8, (min(tile_rows, pl.cdiv(n_rows, 8) * 8) // 8) * 8)  # sublane mult
    # v7x megacore: keep >= 2 grid steps when there is enough data to split.
    if pl.cdiv(n_rows, tr) < 2 and n_rows >= 16:
        tr = pl.cdiv(pl.cdiv(n_rows, 2), 8) * 8
    n_rows_pad = pl.cdiv(n_rows, tr) * tr
    b_pad = n_rows_pad * LANE

    x_pad = jnp.zeros((b_pad, IN_F), jnp.float32).at[:B].set(
        x.astype(jnp.float32))
    xt = x_pad.T.reshape(IN_F, n_rows_pad, LANE)    # (3, rows, 128)

    grid = (n_rows_pad // tr,)
    out = pl.pallas_call(
        mlp_kernel,
        out_shape=jax.ShapeDtypeStruct((n_rows_pad, LANE), jnp.float32),
        grid=grid,
        in_specs=[
            pl.BlockSpec(memory_space=pltpu.SMEM),                   # w1' (3,10)
            pl.BlockSpec(memory_space=pltpu.SMEM),                   # b1' (10,)
            pl.BlockSpec(memory_space=pltpu.SMEM),                   # w2' (10,)
            pl.BlockSpec(memory_space=pltpu.SMEM),                   # b2' (1,)
            pl.BlockSpec((IN_F, tr, LANE), lambda i: (0, i, 0)),     # x
        ],
        out_specs=pl.BlockSpec((tr, LANE), lambda i: (i, 0)),
        compiler_params=pltpu.CompilerParams(
            dimension_semantics=("parallel",),
            vmem_limit_bytes=32 * 1024 * 1024),
    )(w1p, b1p, w2p, b2p, xt)

    # (rows, 128) row-major is exactly batch order; drop padding, restore (B, 1).
    return out.reshape(b_pad, 1)[:B].astype(x.dtype)


def mlp_forward(x, w1, b1, w2, b2, *, tile_rows=2048):
    """x: (B, 3); w1: (3, 10); b1: (10,); w2: (10, 1); b2: (1,) -> (B, 1)."""
    assert x.shape[1] == IN_F
    return _mlp_forward_impl(x, w1, b1, w2, b2, tile_rows=tile_rows)


def init_params(key):
    """PyTorch nn.Linear-style init: U(-1/sqrt(fan_in), 1/sqrt(fan_in))."""
    k1, k2, k3, k4 = jax.random.split(key, 4)
    bound1 = 1.0 / (IN_F ** 0.5)
    w1 = jax.random.uniform(k1, (IN_F, HID), jnp.float32, -bound1, bound1)
    b1 = jax.random.uniform(k2, (HID,), jnp.float32, -bound1, bound1)
    bound2 = 1.0 / (HID ** 0.5)
    w2 = jax.random.uniform(k3, (HID, OUT_F), jnp.float32, -bound2, bound2)
    b2 = jax.random.uniform(k4, (OUT_F,), jnp.float32, -bound2, bound2)
    return w1, b1, w2, b2


def _reference(x, w1, b1, w2, b2):
    return jax.nn.sigmoid(jax.nn.sigmoid(x @ w1 + b1) @ w2 + b2)


if __name__ == "__main__":
    key = jax.random.PRNGKey(0)
    k_x, k_x2, k_p = jax.random.split(key, 3)
    w1, b1, w2, b2 = init_params(k_p)

    # Small demo batch (matches the module's 3-feature input).
    batch = 8
    x = jax.random.normal(k_x, (batch, IN_F), dtype=jnp.float32)
    out = jax.block_until_ready(mlp_forward(x, w1, b1, w2, b2))
    ref = _reference(x, w1, b1, w2, b2)
    assert out.shape == (batch, OUT_F)
    assert jnp.allclose(out, ref, atol=2e-5, rtol=2e-5)

    # Second check exercising padding over multiple 128-wide lane rows.
    batch2 = 300
    x2 = jax.random.normal(k_x2, (batch2, IN_F), dtype=jnp.float32)
    out2 = jax.block_until_ready(mlp_forward(x2, w1, b1, w2, b2))
    ref2 = _reference(x2, w1, b1, w2, b2)
    assert out2.shape == (batch2, OUT_F)
    assert jnp.allclose(out2, ref2, atol=2e-5, rtol=2e-5)

    print("KERNEL_OK")
</pallas_src>

<mosaic_0001>
module attributes {stable_mosaic.version = 11 : i64} {
  func.func @mlp_kernel(%arg0: i32, %arg1: memref<3x10xf32, #tpu.memory_space<smem>>, %arg2: memref<10xf32, #tpu.memory_space<smem>>, %arg3: memref<10xf32, #tpu.memory_space<smem>>, %arg4: memref<1xf32, #tpu.memory_space<smem>>, %arg5: memref<3x8x128xf32, #tpu.memory_space<vmem>>, %arg6: memref<8x128xf32, #tpu.memory_space<vmem>>) attributes {dimension_semantics = [#tpu.dimension_semantics<parallel>], iteration_bounds = array<i64: 1>, scalar_prefetch = 0 : i64, scratch_operands = 0 : i64, tpu.core_type = #tpu.core_type<tc>, window_params = [{transform_indices = @transform_0, window_bounds = array<i64: 3, 10>}, {transform_indices = @transform_1, window_bounds = array<i64: 10>}, {transform_indices = @transform_2, window_bounds = array<i64: 10>}, {transform_indices = @transform_3, window_bounds = array<i64: 1>}, {transform_indices = @transform_4, window_bounds = array<i64: 3, 8, 128>}, {transform_indices = @transform_5, window_bounds = array<i64: 8, 128>}]} {
    %c0 = arith.constant 0 : index
    %c0_0 = arith.constant 0 : index
    %c0_1 = arith.constant 0 : index
    %0 = vector.load %arg5[%c0, %c0_0, %c0_1] : memref<3x8x128xf32, #tpu.memory_space<vmem>>, vector<1x8x128xf32>
    %1 = vector.shape_cast %0 : vector<1x8x128xf32> to vector<8x128xf32>
    %c1 = arith.constant 1 : index
    %c0_2 = arith.constant 0 : index
    %c0_3 = arith.constant 0 : index
    %2 = vector.load %arg5[%c1, %c0_2, %c0_3] : memref<3x8x128xf32, #tpu.memory_space<vmem>>, vector<1x8x128xf32>
    %3 = vector.shape_cast %2 : vector<1x8x128xf32> to vector<8x128xf32>
    %c2 = arith.constant 2 : index
    %c0_4 = arith.constant 0 : index
    %c0_5 = arith.constant 0 : index
    %4 = vector.load %arg5[%c2, %c0_4, %c0_5] : memref<3x8x128xf32, #tpu.memory_space<vmem>>, vector<1x8x128xf32>
    %5 = vector.shape_cast %4 : vector<1x8x128xf32> to vector<8x128xf32>
    %c0_6 = arith.constant 0 : index
    %6 = memref.load %arg4[%c0_6] : memref<1xf32, #tpu.memory_space<smem>>
    %7 = vector.broadcast %6 : f32 to vector<8x128xf32>
    %c0_7 = arith.constant 0 : index
    %c0_8 = arith.constant 0 : index
    %8 = memref.load %arg1[%c0_7, %c0_8] : memref<3x10xf32, #tpu.memory_space<smem>>
    %9 = vector.broadcast %8 : f32 to vector<8x128xf32>
    %10 = arith.mulf %1, %9 : vector<8x128xf32>
    %c1_9 = arith.constant 1 : index
    %c0_10 = arith.constant 0 : index
    %11 = memref.load %arg1[%c1_9, %c0_10] : memref<3x10xf32, #tpu.memory_space<smem>>
    %12 = vector.broadcast %11 : f32 to vector<8x128xf32>
    %13 = arith.mulf %3, %12 : vector<8x128xf32>
    %14 = arith.addf %10, %13 : vector<8x128xf32>
    %c2_11 = arith.constant 2 : index
    %c0_12 = arith.constant 0 : index
    %15 = memref.load %arg1[%c2_11, %c0_12] : memref<3x10xf32, #tpu.memory_space<smem>>
    %16 = vector.broadcast %15 : f32 to vector<8x128xf32>
    %17 = arith.mulf %5, %16 : vector<8x128xf32>
    %18 = arith.addf %14, %17 : vector<8x128xf32>
    %c0_13 = arith.constant 0 : index
    %19 = memref.load %arg2[%c0_13] : memref<10xf32, #tpu.memory_space<smem>>
    %20 = vector.broadcast %19 : f32 to vector<8x128xf32>
    %21 = arith.addf %18, %20 : vector<8x128xf32>
    %c0_14 = arith.constant 0 : index
    %22 = memref.load %arg3[%c0_14] : memref<10xf32, #tpu.memory_space<smem>>
    %23 = math.tanh %21 : vector<8x128xf32>
    %24 = vector.broadcast %22 : f32 to vector<8x128xf32>
    %25 = arith.mulf %24, %23 : vector<8x128xf32>
    %26 = arith.addf %7, %25 : vector<8x128xf32>
    %c0_15 = arith.constant 0 : index
    %c1_16 = arith.constant 1 : index
    %27 = memref.load %arg1[%c0_15, %c1_16] : memref<3x10xf32, #tpu.memory_space<smem>>
    %28 = vector.broadcast %27 : f32 to vector<8x128xf32>
    %29 = arith.mulf %1, %28 : vector<8x128xf32>
    %c1_17 = arith.constant 1 : index
    %c1_18 = arith.constant 1 : index
    %30 = memref.load %arg1[%c1_17, %c1_18] : memref<3x10xf32, #tpu.memory_space<smem>>
    %31 = vector.broadcast %30 : f32 to vector<8x128xf32>
    %32 = arith.mulf %3, %31 : vector<8x128xf32>
    %33 = arith.addf %29, %32 : vector<8x128xf32>
    %c2_19 = arith.constant 2 : index
    %c1_20 = arith.constant 1 : index
    %34 = memref.load %arg1[%c2_19, %c1_20] : memref<3x10xf32, #tpu.memory_space<smem>>
    %35 = vector.broadcast %34 : f32 to vector<8x128xf32>
    %36 = arith.mulf %5, %35 : vector<8x128xf32>
    %37 = arith.addf %33, %36 : vector<8x128xf32>
    %c1_21 = arith.constant 1 : index
    %38 = memref.load %arg2[%c1_21] : memref<10xf32, #tpu.memory_space<smem>>
    %39 = vector.broadcast %38 : f32 to vector<8x128xf32>
    %40 = arith.addf %37, %39 : vector<8x128xf32>
    %c1_22 = arith.constant 1 : index
    %41 = memref.load %arg3[%c1_22] : memref<10xf32, #tpu.memory_space<smem>>
    %42 = math.tanh %40 : vector<8x128xf32>
    %43 = vector.broadcast %41 : f32 to vector<8x128xf32>
    %44 = arith.mulf %43, %42 : vector<8x128xf32>
    %45 = arith.addf %26, %44 : vector<8x128xf32>
    %c0_23 = arith.constant 0 : index
    %c2_24 = arith.constant 2 : index
    %46 = memref.load %arg1[%c0_23, %c2_24] : memref<3x10xf32, #tpu.memory_space<smem>>
    %47 = vector.broadcast %46 : f32 to vector<8x128xf32>
    %48 = arith.mulf %1, %47 : vector<8x128xf32>
    %c1_25 = arith.constant 1 : index
    %c2_26 = arith.constant 2 : index
    %49 = memref.load %arg1[%c1_25, %c2_26] : memref<3x10xf32, #tpu.memory_space<smem>>
    %50 = vector.broadcast %49 : f32 to vector<8x128xf32>
    %51 = arith.mulf %3, %50 : vector<8x128xf32>
    %52 = arith.addf %48, %51 : vector<8x128xf32>
    %c2_27 = arith.constant 2 : index
    %c2_28 = arith.constant 2 : index
    %53 = memref.load %arg1[%c2_27, %c2_28] : memref<3x10xf32, #tpu.memory_space<smem>>
    %54 = vector.broadcast %53 : f32 to vector<8x128xf32>
    %55 = arith.mulf %5, %54 : vector<8x128xf32>
    %56 = arith.addf %52, %55 : vector<8x128xf32>
    %c2_29 = arith.constant 2 : index
    %57 = memref.load %arg2[%c2_29] : memref<10xf32, #tpu.memory_space<smem>>
    %58 = vector.broadcast %57 : f32 to vector<8x128xf32>
    %59 = arith.addf %56, %58 : vector<8x128xf32>
    %c2_30 = arith.constant 2 : index
    %60 = memref.load %arg3[%c2_30] : memref<10xf32, #tpu.memory_space<smem>>
    %61 = math.tanh %59 : vector<8x128xf32>
    %62 = vector.broadcast %60 : f32 to vector<8x128xf32>
    %63 = arith.mulf %62, %61 : vector<8x128xf32>
    %64 = arith.addf %45, %63 : vector<8x128xf32>
    %c0_31 = arith.constant 0 : index
    %c3 = arith.constant 3 : index
    %65 = memref.load %arg1[%c0_31, %c3] : memref<3x10xf32, #tpu.memory_space<smem>>
    %66 = vector.broadcast %65 : f32 to vector<8x128xf32>
    %67 = arith.mulf %1, %66 : vector<8x128xf32>
    %c1_32 = arith.constant 1 : index
    %c3_33 = arith.constant 3 : index
    %68 = memref.load %arg1[%c1_32, %c3_33] : memref<3x10xf32, #tpu.memory_space<smem>>
    %69 = vector.broadcast %68 : f32 to vector<8x128xf32>
    %70 = arith.mulf %3, %69 : vector<8x128xf32>
    %71 = arith.addf %67, %70 : vector<8x128xf32>
    %c2_34 = arith.constant 2 : index
    %c3_35 = arith.constant 3 : index
    %72 = memref.load %arg1[%c2_34, %c3_35] : memref<3x10xf32, #tpu.memory_space<smem>>
    %73 = vector.broadcast %72 : f32 to vector<8x128xf32>
    %74 = arith.mulf %5, %73 : vector<8x128xf32>
    %75 = arith.addf %71, %74 : vector<8x128xf32>
    %c3_36 = arith.constant 3 : index
    %76 = memref.load %arg2[%c3_36] : memref<10xf32, #tpu.memory_space<smem>>
    %77 = vector.broadcast %76 : f32 to vector<8x128xf32>
    %78 = arith.addf %75, %77 : vector<8x128xf32>
    %c3_37 = arith.constant 3 : index
    %79 = memref.load %arg3[%c3_37] : memref<10xf32, #tpu.memory_space<smem>>
    %80 = math.tanh %78 : vector<8x128xf32>
    %81 = vector.broadcast %79 : f32 to vector<8x128xf32>
    %82 = arith.mulf %81, %80 : vector<8x128xf32>
    %83 = arith.addf %64, %82 : vector<8x128xf32>
    %c0_38 = arith.constant 0 : index
    %c4 = arith.constant 4 : index
    %84 = memref.load %arg1[%c0_38, %c4] : memref<3x10xf32, #tpu.memory_space<smem>>
    %85 = vector.broadcast %84 : f32 to vector<8x128xf32>
    %86 = arith.mulf %1, %85 : vector<8x128xf32>
    %c1_39 = arith.constant 1 : index
    %c4_40 = arith.constant 4 : index
    %87 = memref.load %arg1[%c1_39, %c4_40] : memref<3x10xf32, #tpu.memory_space<smem>>
    %88 = vector.broadcast %87 : f32 to vector<8x128xf32>
    %89 = arith.mulf %3, %88 : vector<8x128xf32>
    %90 = arith.addf %86, %89 : vector<8x128xf32>
    %c2_41 = arith.constant 2 : index
    %c4_42 = arith.constant 4 : index
    %91 = memref.load %arg1[%c2_41, %c4_42] : memref<3x10xf32, #tpu.memory_space<smem>>
    %92 = vector.broadcast %91 : f32 to vector<8x128xf32>
    %93 = arith.mulf %5, %92 : vector<8x128xf32>
    %94 = arith.addf %90, %93 : vector<8x128xf32>
    %c4_43 = arith.constant 4 : index
    %95 = memref.load %arg2[%c4_43] : memref<10xf32, #tpu.memory_space<smem>>
    %96 = vector.broadcast %95 : f32 to vector<8x128xf32>
    %97 = arith.addf %94, %96 : vector<8x128xf32>
    %c4_44 = arith.constant 4 : index
    %98 = memref.load %arg3[%c4_44] : memref<10xf32, #tpu.memory_space<smem>>
    %99 = math.tanh %97 : vector<8x128xf32>
    %100 = vector.broadcast %98 : f32 to vector<8x128xf32>
    %101 = arith.mulf %100, %99 : vector<8x128xf32>
    %102 = arith.addf %83, %101 : vector<8x128xf32>
    %c0_45 = arith.constant 0 : index
    %c5 = arith.constant 5 : index
    %103 = memref.load %arg1[%c0_45, %c5] : memref<3x10xf32, #tpu.memory_space<smem>>
    %104 = vector.broadcast %103 : f32 to vector<8x128xf32>
    %105 = arith.mulf %1, %104 : vector<8x128xf32>
    %c1_46 = arith.constant 1 : index
    %c5_47 = arith.constant 5 : index
    %106 = memref.load %arg1[%c1_46, %c5_47] : memref<3x10xf32, #tpu.memory_space<smem>>
    %107 = vector.broadcast %106 : f32 to vector<8x128xf32>
    %108 = arith.mulf %3, %107 : vector<8x128xf32>
    %109 = arith.addf %105, %108 : vector<8x128xf32>
    %c2_48 = arith.constant 2 : index
    %c5_49 = arith.constant 5 : index
    %110 = memref.load %arg1[%c2_48, %c5_49] : memref<3x10xf32, #tpu.memory_space<smem>>
    %111 = vector.broadcast %110 : f32 to vector<8x128xf32>
    %112 = arith.mulf %5, %111 : vector<8x128xf32>
    %113 = arith.addf %109, %112 : vector<8x128xf32>
    %c5_50 = arith.constant 5 : index
    %114 = memref.load %arg2[%c5_50] : memref<10xf32, #tpu.memory_space<smem>>
    %115 = vector.broadcast %114 : f32 to vector<8x128xf32>
    %116 = arith.addf %113, %115 : vector<8x128xf32>
    %c5_51 = arith.constant 5 : index
    %117 = memref.load %arg3[%c5_51] : memref<10xf32, #tpu.memory_space<smem>>
    %118 = math.tanh %116 : vector<8x128xf32>
    %119 = vector.broadcast %117 : f32 to vector<8x128xf32>
    %120 = arith.mulf %119, %118 : vector<8x128xf32>
    %121 = arith.addf %102, %120 : vector<8x128xf32>
    %c0_52 = arith.constant 0 : index
    %c6 = arith.constant 6 : index
    %122 = memref.load %arg1[%c0_52, %c6] : memref<3x10xf32, #tpu.memory_space<smem>>
    %123 = vector.broadcast %122 : f32 to vector<8x128xf32>
    %124 = arith.mulf %1, %123 : vector<8x128xf32>
    %c1_53 = arith.constant 1 : index
    %c6_54 = arith.constant 6 : index
    %125 = memref.load %arg1[%c1_53, %c6_54] : memref<3x10xf32, #tpu.memory_space<smem>>
    %126 = vector.broadcast %125 : f32 to vector<8x128xf32>
    %127 = arith.mulf %3, %126 : vector<8x128xf32>
    %128 = arith.addf %124, %127 : vector<8x128xf32>
    %c2_55 = arith.constant 2 : index
    %c6_56 = arith.constant 6 : index
    %129 = memref.load %arg1[%c2_55, %c6_56] : memref<3x10xf32, #tpu.memory_space<smem>>
    %130 = vector.broadcast %129 : f32 to vector<8x128xf32>
    %131 = arith.mulf %5, %130 : vector<8x128xf32>
    %132 = arith.addf %128, %131 : vector<8x128xf32>
    %c6_57 = arith.constant 6 : index
    %133 = memref.load %arg2[%c6_57] : memref<10xf32, #tpu.memory_space<smem>>
    %134 = vector.broadcast %133 : f32 to vector<8x128xf32>
    %135 = arith.addf %132, %134 : vector<8x128xf32>
    %c6_58 = arith.constant 6 : index
    %136 = memref.load %arg3[%c6_58] : memref<10xf32, #tpu.memory_space<smem>>
    %137 = math.tanh %135 : vector<8x128xf32>
    %138 = vector.broadcast %136 : f32 to vector<8x128xf32>
    %139 = arith.mulf %138, %137 : vector<8x128xf32>
    %140 = arith.addf %121, %139 : vector<8x128xf32>
    %c0_59 = arith.constant 0 : index
    %c7 = arith.constant 7 : index
    %141 = memref.load %arg1[%c0_59, %c7] : memref<3x10xf32, #tpu.memory_space<smem>>
    %142 = vector.broadcast %141 : f32 to vector<8x128xf32>
    %143 = arith.mulf %1, %142 : vector<8x128xf32>
    %c1_60 = arith.constant 1 : index
    %c7_61 = arith.constant 7 : index
    %144 = memref.load %arg1[%c1_60, %c7_61] : memref<3x10xf32, #tpu.memory_space<smem>>
    %145 = vector.broadcast %144 : f32 to vector<8x128xf32>
    %146 = arith.mulf %3, %145 : vector<8x128xf32>
    %147 = arith.addf %143, %146 : vector<8x128xf32>
    %c2_62 = arith.constant 2 : index
    %c7_63 = arith.constant 7 : index
    %148 = memref.load %arg1[%c2_62, %c7_63] : memref<3x10xf32, #tpu.memory_space<smem>>
    %149 = vector.broadcast %148 : f32 to vector<8x128xf32>
    %150 = arith.mulf %5, %149 : vector<8x128xf32>
    %151 = arith.addf %147, %150 : vector<8x128xf32>
    %c7_64 = arith.constant 7 : index
    %152 = memref.load %arg2[%c7_64] : memref<10xf32, #tpu.memory_space<smem>>
    %153 = vector.broadcast %152 : f32 to vector<8x128xf32>
    %154 = arith.addf %151, %153 : vector<8x128xf32>
    %c7_65 = arith.constant 7 : index
    %155 = memref.load %arg3[%c7_65] : memref<10xf32, #tpu.memory_space<smem>>
    %156 = math.tanh %154 : vector<8x128xf32>
    %157 = vector.broadcast %155 : f32 to vector<8x128xf32>
    %158 = arith.mulf %157, %156 : vector<8x128xf32>
    %159 = arith.addf %140, %158 : vector<8x128xf32>
    %c0_66 = arith.constant 0 : index
    %c8 = arith.constant 8 : index
    %160 = memref.load %arg1[%c0_66, %c8] : memref<3x10xf32, #tpu.memory_space<smem>>
    %161 = vector.broadcast %160 : f32 to vector<8x128xf32>
    %162 = arith.mulf %1, %161 : vector<8x128xf32>
    %c1_67 = arith.constant 1 : index
    %c8_68 = arith.constant 8 : index
    %163 = memref.load %arg1[%c1_67, %c8_68] : memref<3x10xf32, #tpu.memory_space<smem>>
    %164 = vector.broadcast %163 : f32 to vector<8x128xf32>
    %165 = arith.mulf %3, %164 : vector<8x128xf32>
    %166 = arith.addf %162, %165 : vector<8x128xf32>
    %c2_69 = arith.constant 2 : index
    %c8_70 = arith.constant 8 : index
    %167 = memref.load %arg1[%c2_69, %c8_70] : memref<3x10xf32, #tpu.memory_space<smem>>
    %168 = vector.broadcast %167 : f32 to vector<8x128xf32>
    %169 = arith.mulf %5, %168 : vector<8x128xf32>
    %170 = arith.addf %166, %169 : vector<8x128xf32>
    %c8_71 = arith.constant 8 : index
    %171 = memref.load %arg2[%c8_71] : memref<10xf32, #tpu.memory_space<smem>>
    %172 = vector.broadcast %171 : f32 to vector<8x128xf32>
    %173 = arith.addf %170, %172 : vector<8x128xf32>
    %c8_72 = arith.constant 8 : index
    %174 = memref.load %arg3[%c8_72] : memref<10xf32, #tpu.memory_space<smem>>
    %175 = math.tanh %173 : vector<8x128xf32>
    %176 = vector.broadcast %174 : f32 to vector<8x128xf32>
    %177 = arith.mulf %176, %175 : vector<8x128xf32>
    %178 = arith.addf %159, %177 : vector<8x128xf32>
    %c0_73 = arith.constant 0 : index
    %c9 = arith.constant 9 : index
    %179 = memref.load %arg1[%c0_73, %c9] : memref<3x10xf32, #tpu.memory_space<smem>>
    %180 = vector.broadcast %179 : f32 to vector<8x128xf32>
    %181 = arith.mulf %1, %180 : vector<8x128xf32>
    %c1_74 = arith.constant 1 : index
    %c9_75 = arith.constant 9 : index
    %182 = memref.load %arg1[%c1_74, %c9_75] : memref<3x10xf32, #tpu.memory_space<smem>>
    %183 = vector.broadcast %182 : f32 to vector<8x128xf32>
    %184 = arith.mulf %3, %183 : vector<8x128xf32>
    %185 = arith.addf %181, %184 : vector<8x128xf32>
    %c2_76 = arith.constant 2 : index
    %c9_77 = arith.constant 9 : index
    %186 = memref.load %arg1[%c2_76, %c9_77] : memref<3x10xf32, #tpu.memory_space<smem>>
    %187 = vector.broadcast %186 : f32 to vector<8x128xf32>
    %188 = arith.mulf %5, %187 : vector<8x128xf32>
    %189 = arith.addf %185, %188 : vector<8x128xf32>
    %c9_78 = arith.constant 9 : index
    %190 = memref.load %arg2[%c9_78] : memref<10xf32, #tpu.memory_space<smem>>
    %191 = vector.broadcast %190 : f32 to vector<8x128xf32>
    %192 = arith.addf %189, %191 : vector<8x128xf32>
    %c9_79 = arith.constant 9 : index
    %193 = memref.load %arg3[%c9_79] : memref<10xf32, #tpu.memory_space<smem>>
    %194 = math.tanh %192 : vector<8x128xf32>
    %195 = vector.broadcast %193 : f32 to vector<8x128xf32>
    %196 = arith.mulf %195, %194 : vector<8x128xf32>
    %197 = arith.addf %178, %196 : vector<8x128xf32>
    %cst = arith.constant 5.000000e-01 : f32
    %198 = vector.broadcast %cst : f32 to vector<8x128xf32>
    %199 = arith.mulf %198, %197 : vector<8x128xf32>
    %200 = math.tanh %199 : vector<8x128xf32>
    %cst_80 = arith.constant 5.000000e-01 : f32
    %201 = vector.broadcast %cst_80 : f32 to vector<8x128xf32>
    %202 = arith.mulf %201, %200 : vector<8x128xf32>
    %cst_81 = arith.constant 5.000000e-01 : f32
    %203 = vector.broadcast %cst_81 : f32 to vector<8x128xf32>
    %204 = arith.addf %202, %203 : vector<8x128xf32>
    %c0_82 = arith.constant 0 : index
    %c0_83 = arith.constant 0 : index
    %205 = vector.load %arg6[%c0_82, %c0_83] : memref<8x128xf32, #tpu.memory_space<vmem>>, vector<8x128xf32>
    tpu.vector_store %arg6[%c0_82, %c0_83], %204 {strides = array<i32>} : memref<8x128xf32, #tpu.memory_space<vmem>>, vector<8x128xf32>,
    return
  }
  func.func @transform_0(%arg0: i32) -> (i32, i32) {
    %c0_i32 = arith.constant 0 : i32
    %c0_i32_0 = arith.constant 0 : i32
    %c0_i32_1 = arith.constant 0 : i32
    return %c0_i32, %c0_i32_0 : i32, i32
  }
  func.func @transform_1(%arg0: i32) -> i32 {
    %c0_i32 = arith.constant 0 : i32
    %c0_i32_0 = arith.constant 0 : i32
    return %c0_i32 : i32
  }
  func.func @transform_2(%arg0: i32) -> i32 {
    %c0_i32 = arith.constant 0 : i32
    %c0_i32_0 = arith.constant 0 : i32
    return %c0_i32 : i32
  }
  func.func @transform_3(%arg0: i32) -> i32 {
    %c0_i32 = arith.constant 0 : i32
    %c0_i32_0 = arith.constant 0 : i32
    return %c0_i32 : i32
  }
  func.func @transform_4(%arg0: i32) -> (i32, i32, i32) {
    %c0_i32 = arith.constant 0 : i32
    %c0_i32_0 = arith.constant 0 : i32
    %c0_i32_1 = arith.constant 0 : i32
    return %c0_i32, %arg0, %c0_i32_0 : i32, i32, i32
  }
  func.func @transform_5(%arg0: i32) -> (i32, i32) {
    %c0_i32 = arith.constant 0 : i32
    %c0_i32_0 = arith.constant 0 : i32
    return %arg0, %c0_i32 : i32, i32
  }
}

</mosaic_0001>

<bundles_post_ra>
// kernel: _mlp_forward_impl.1
= control target key start
LH: loop header
LB: loop body
LE: loop exit
PB: predicated region body
PF: predicated region fallthrough
CT: control target
= control target key end

     0   :  { %11 = vsyncpa [#allocation4], 0  ;;  %s596_s0 = inlined_call_operand.vmem [shape: f32[3,10], index: 0, kind: input, shape index: {}]   ;;  %s597_s1 = inlined_call_operand.vmem [shape: f32[10], index: 1, kind: input, shape index: {}]   ;;  %s598_s2 = inlined_call_operand.vmem [shape: f32[10], index: 2, kind: input, shape index: {}]   ;;  %s599_s3 = inlined_call_operand.<no memory space> [shape: f32[1], index: 3, kind: input, shape index: {}]   ;;  %s600_s4 = inlined_call_operand.vmem [shape: f32[3,8,128], index: 4, kind: input, shape index: {}]   ;;  %s601_s5 = inlined_call_operand.vmem [shape: f32[8,128], index: 5, kind: output, shape index: {}]  }
   0x1   :  { %12 = vsyncpa [#allocation6], 0  ;;  %s29_s20 = sshll.u32 %s597_s1, 4  ;;  %s19_s23 = sshll.u32 %s596_s0, 4  ;;  %s30_s20 = int_to_ptr.vmem [resolvable:$true] %s29_s20  ;;  %s20_s23 = int_to_ptr.vmem [resolvable:$true] %s19_s23 }
   0x2   :  { %s339_s24 = scalar_lea.vmem %s30_s20, 16  ;;  %p344_p1 = scmp.lt.s32.totalorder %s30_s20, %s30_s20 }
   0x3   :  { %p340_p0 = scmp.ne.s32.totalorder %s30_s20, %s339_s24  ;;  %p345_p2 = scmp.lt.s32.totalorder %s339_s24, %s339_s24 }
   0x5   :  { %p346_p3 = por %p345_p2, %p344_p1 }
   0x7   :  { %p347_p4 = pnand %p346_p3, %p340_p0 }
   0x9   :  { %350 = shalt.err (!%p347_p4)
}
   0xa   :  { %s379_s25 = smov [#allocation5]   ;;  %s351_s26 = scalar_lea.vmem %s20_s23, 64 }
   0xb   :  { %32 = dma.vmem_to_smem %s30_s20, 16, %s379_s25, [#allocation6]  }
   0xc   :  { %p352_p5 = scmp.ne.s32.totalorder %s20_s23, %s351_s26  ;;  %p356_p6 = scmp.lt.s32.totalorder %s20_s23, %s20_s23 }
   0xd   :  { %p357_p7 = scmp.lt.s32.totalorder %s351_s26, %s351_s26 }
   0xf   :  { %p358_p8 = por %p357_p7, %p356_p6 }
  0x11   :  { %p359_p9 = pnand %p358_p8, %p352_p5 }
  0x13   :  { %362 = shalt.err (!%p359_p9)
}
  0x14   :  { %s380_s1 = smov [#allocation3]   ;;  %s39_s28 = sshll.u32 %s598_s2, 4  ;;  %s40_s28 = int_to_ptr.vmem [resolvable:$true] %s39_s28 }
  0x15   :  { %22 = dma.vmem_to_smem %s20_s23, 64, %s380_s1, [#allocation4]  }
  0x16   :  { %s363_s29 = scalar_lea.vmem %s40_s28, 16  ;;  %p368_p11 = scmp.lt.s32.totalorder %s40_s28, %s40_s28 }
  0x17   :  { %p364_p10 = scmp.ne.s32.totalorder %s40_s28, %s363_s29  ;;  %p369_p12 = scmp.lt.s32.totalorder %s363_s29, %s363_s29 }
  0x19   :  { %p370_p13 = por %p369_p12, %p368_p11 }
  0x1b   :  { %p371_p0 = pnand %p370_p13, %p364_p10 }
  0x1d   :  { %374 = shalt.err (!%p371_p0)
}
  0x1e   :  { %s381_s30 = smov [#allocation7]  }
  0x1f   :  { %42 = dma.vmem_to_smem %s40_s28, 16, %s381_s30, [#allocation6]  }
  0x20   :  { %375 = dma.done.wait [#allocation4], 64  }
  0x21   :  { %376 = vsyncadd [#allocation4], 4294967232 }
  0x22   :  { %377 = dma.done.wait [#allocation6], 32  }
  0x23   :  { %378 = vsyncadd [#allocation6], 4294967264 }
  0x24   :  { %56 = sfence }
  0x25   :  { %s64_s6 = sld [smem:[#allocation3]]  ;;  %s269_s2 = sld [smem:[#allocation3 + $0x1]]  ;;  %v426_v0 = vld [vmem:[%s600_s4] sm:$0xff]  ;;  %v431_v1 = vld [vmem:[%s600_s4 + $0x8] sm:$0xff]  ;;  %v436_v2 = vld [vmem:[%s600_s4 + $0x10] sm:$0xff]  ;;  %v63_v37 = vstv %s599_s3 }
  0x26   :  { %s267_s7 = sld [smem:[#allocation3 + $0x80]]  ;;  %s270_s10 = sld [smem:[#allocation3 + $0x81]] }
  0x27   :  { %s268_s8 = sld [smem:[#allocation3 + $0x100]]  ;;  %s271_s13 = sld [smem:[#allocation3 + $0x101]] }
  0x28   :  { %s421_s9 = sld [smem:[#allocation5]]  ;;  %s438_s18 = sld [smem:[#allocation5 + $0x1]] }
  0x29   :  { %s274_s19 = sld [smem:[#allocation3 + $0x2]]  ;;  %s449_s4 = sld [smem:[#allocation3 + $0x3]] }
  0x2a   :  { %s440_s20 = sld [smem:[#allocation3 + $0x82]]  ;;  %s451_s23 = sld [smem:[#allocation3 + $0x83]] }
  0x2b   :  { %v65_v3 = vstv %s64_s6  ;;  %s442_s21 = sld [smem:[#allocation3 + $0x102]]  ;;  %v84_v9 = vstv %s269_s2  ;;  %s453_s24 = sld [smem:[#allocation3 + $0x103]] }
  0x2c   :  { %v66_v4 = vmul.f32 %v65_v3, %v426_v0  ;;  %v68_v5 = vstv %s267_s7  ;;  %s445_s22 = sld [smem:[#allocation5 + $0x2]]  ;;  %v87_v10 = vstv %s270_s10  ;;  %v85_v12 = vmul.f32 %v84_v9, %v426_v0  ;;  %s457_s25 = sld [smem:[#allocation5 + $0x3]] }
  0x2d   :  { %v72_v6 = vstv %s268_s8  ;;  %v69_v7 = vmul.f32 %v431_v1, %v68_v5  ;;  %v88_v13 = vmul.f32 %v431_v1, %v87_v10  ;;  %v91_v14 = vstv %s271_s13  ;;  %s459_s26 = sld [smem:[#allocation3 + $0x4]]  ;;  %s467_s27 = sld [smem:[#allocation7]] }
  0x2e   :  { %v73_v8 = vmul.f32 %v436_v2, %v72_v6  ;;  %v76_v15 = vstv %s421_s9  ;;  %v92_v16 = vmul.f32 %v436_v2, %v91_v14  ;;  %s463_s1 = sld [smem:[#allocation3 + $0x84]]  ;;  %v95_v22 = vstv %s438_s18  ;;  %s475_s28 = sld [smem:[#allocation3 + $0x5]] }
  0x2f   :  { %v70_v11 = vadd.f32 %v69_v7, %v66_v4  ;;  %v103_v17 = vstv %s274_s19  ;;  %s465_s0 = sld [smem:[#allocation3 + $0x104]]  ;;  %v89_v19 = vadd.f32 %v88_v13, %v85_v12  ;;  %s477_s29 = sld [smem:[#allocation3 + $0x85]]  ;;  %v122_v29 = vstv %s449_s4 }
  0x30   :  { %v104_v20 = vmul.f32 %v103_v17, %v426_v0  ;;  %v106_v21 = vstv %s440_s20  ;;  %s481_s30 = sld [smem:[#allocation5 + $0x4]]  ;;  %s483_s6 = sld [smem:[#allocation3 + $0x105]]  ;;  %v123_v31 = vmul.f32 %v122_v29, %v426_v0  ;;  %v125_v32 = vstv %s451_s23 }
  0x31   :  { %v74_v18 = vadd.f32 %v73_v8, %v70_v11  ;;  %v107_v23 = vmul.f32 %v431_v1, %v106_v21  ;;  %v110_v24 = vstv %s442_s21  ;;  %v93_v27 = vadd.f32 %v92_v16, %v89_v19  ;;  %s485_s7 = sld [smem:[#allocation7 + $0x1]]  ;;  %s490_s8 = sld [smem:[#allocation3 + $0x6]] }
  0x32   :  { %v114_v25 = vstv %s445_s22  ;;  %v111_v28 = vmul.f32 %v436_v2, %v110_v24  ;;  %v129_v33 = vstv %s453_s24  ;;  %v126_v35 = vmul.f32 %v431_v1, %v125_v32  ;;  %s494_s9 = sld [smem:[#allocation3 + $0x86]]  ;;  %s500_s11 = sld [smem:[#allocation5 + $0x5]] }
  0x33   :  { %v77_v26 = vadd.f32 %v76_v15, %v74_v18  ;;  %v108_v30 = vadd.f32 %v107_v23, %v104_v20  ;;  %v96_v34 = vadd.f32 %v95_v22, %v93_v27  ;;  %v130_v36 = vmul.f32 %v436_v2, %v129_v33  ;;  %s502_s12 = sld [smem:[#allocation3 + $0x106]]  ;;  %s504_s13 = sld [smem:[#allocation7 + $0x2]] }
  0x34   :  { %v141_v39 = vstv %s459_s26  ;;  %v127_v40 = vadd.f32 %v126_v35, %v123_v31  ;;  %v144_v42 = vstv %s463_s1  ;;  %s508_s14 = sld [smem:[#allocation3 + $0x7]]  ;;  %v133_v44 = vstv %s457_s25  ;;  %s513_s15 = sld [smem:[#allocation5 + $0x6]] }
  0x35   :  { %317 = vtanh.f32 %v77_v26  ;;  %v112_v38 = vadd.f32 %v111_v28, %v108_v30  ;;  %v142_v41 = vmul.f32 %v141_v39, %v426_v0  ;;  %v145_v45 = vmul.f32 %v431_v1, %v144_v42  ;;  %s518_s16 = sld [smem:[#allocation3 + $0x87]]  ;;  %s524_s18 = sld [smem:[#allocation7 + $0x3]] }
  0x36   :  { %319 = vtanh.f32 %v96_v34  ;;  %v148_v46 = vstv %s465_s0  ;;  %v80_v47 = vstv %s467_s27  ;;  %v131_v48 = vadd.f32 %v130_v36, %v127_v40  ;;  %s520_s17 = sld [smem:[#allocation3 + $0x107]]  ;;  %s529_s19 = sld [smem:[#allocation3 + $0x8]] }
  0x37   :  { %v115_v43 = vadd.f32 %v114_v25, %v112_v38  ;;  %v149_v49 = vmul.f32 %v436_v2, %v148_v46  ;;  %v160_v50 = vstv %s475_s28  ;;  %v146_v51 = vadd.f32 %v145_v45, %v142_v41  ;;  %s534_s20 = sld [smem:[#allocation5 + $0x7]]  ;;  %s538_s21 = sld [smem:[#allocation3 + $0x88]] }
  0x38   :  { %v161_v52 = vmul.f32 %v160_v50, %v426_v0  ;;  %v163_v53 = vstv %s477_s29  ;;  %v134_v54 = vadd.f32 %v133_v44, %v131_v48  ;;  %v152_v55 = vstv %s481_s30  ;;  %s540_s22 = sld [smem:[#allocation3 + $0x108]]  ;;  %s542_s4 = sld [smem:[#allocation7 + $0x4]] }
  0x39   :  { %321 = vtanh.f32 %v115_v43  ;;  %v164_v56 = vmul.f32 %v431_v1, %v163_v53  ;;  %v167_v57 = vstv %s483_s6  ;;  %v99_v58 = vstv %s485_s7  ;;  %s550_s23 = sld [smem:[#allocation3 + $0x9]]  ;;  %s558_s25 = sld [smem:[#allocation5 + $0x8]] }
  0x3a   :  { %v150_v59 = vadd.f32 %v149_v49, %v146_v51  ;;  %v168_v60 = vmul.f32 %v436_v2, %v167_v57  ;;  %v179_v61 = vstv %s490_s8  ;;  %323 = vtanh.f32 %v134_v54  ;;  %s552_s24 = sld [smem:[#allocation3 + $0x89]]  ;;  %s568_s27 = sld [smem:[#allocation7 + $0x5]] }
  0x3b   :  { %v165_v62 = vadd.f32 %v164_v56, %v161_v52  ;;  %v180_v63 = vmul.f32 %v179_v61, %v426_v0  ;;  %v182_v3 = vstv %s494_s9  ;;  %v171_v5 = vstv %s500_s11  ;;  %s560_s26 = sld [smem:[#allocation3 + $0x109]]  ;;  %s578_s28 = sld [smem:[#allocation7 + $0x6]] }
  0x3c   :  { %v153_v4 = vadd.f32 %v152_v55, %v150_v59  ;;  %v183_v6 = vmul.f32 %v431_v1, %v182_v3  ;;  %v186_v7 = vstv %s502_s12  ;;  %v118_v9 = vstv %s504_s13  ;;  %s573_s3 = sld [smem:[#allocation5 + $0x9]]  ;;  %s303_s29 = sld [smem:[#allocation7 + $0x7]] }
  0x3d   :  { %v169_v10 = vadd.f32 %v168_v60, %v165_v62  ;;  %v187_v11 = vmul.f32 %v436_v2, %v186_v7  ;;  %v198_v12 = vstv %s508_s14  ;;  %v190_v18 = vstv %s513_s15  ;;  %s308_s30 = sld [smem:[#allocation7 + $0x8]]  ;;  %s313_s6 = sld [smem:[#allocation7 + $0x9]] }
  0x3e   :  { %325 = vtanh.f32 %v153_v4  ;;  %v184_v14 = vadd.f32 %v183_v6, %v180_v63  ;;  %v199_v15 = vmul.f32 %v198_v12, %v426_v0  ;;  %v201_v19 = vstv %s518_s16 }
  0x3f   :  { %v318_v8 = vpop.eup %317  ;;  %v172_v17 = vadd.f32 %v171_v5, %v169_v10  ;;  %v205_v20 = vstv %s520_s17  ;;  %v202_v24 = vmul.f32 %v431_v1, %v201_v19  ;;  %v137_v25 = vstv %s524_s18 }
  0x40   :  { %v81_v13 = vmul.f32 %v318_v8, %v80_v47  ;;  %v320_v16 = vpop.eup %319  ;;  %v188_v23 = vadd.f32 %v187_v11, %v184_v14  ;;  %v206_v26 = vmul.f32 %v436_v2, %v205_v20  ;;  %v217_v27 = vstv %s529_s19 }
  0x41   :  { %v100_v22 = vmul.f32 %v320_v16, %v99_v58  ;;  %327 = vtanh.f32 %v172_v17  ;;  %v203_v31 = vadd.f32 %v202_v24, %v199_v15  ;;  %v218_v32 = vmul.f32 %v217_v27, %v426_v0 }
  0x42   :  { %v82_v21 = vadd.f32 %v81_v13, %v63_v37  ;;  %v191_v30 = vadd.f32 %v190_v18, %v188_v23  ;;  %v209_v34 = vstv %s534_s20  ;;  %v220_v35 = vstv %s538_s21 }
  0x43   :  { %v322_v28 = vpop.eup %321  ;;  %v224_v36 = vstv %s540_s22  ;;  %v207_v37 = vadd.f32 %v206_v26, %v203_v31  ;;  %v221_v38 = vmul.f32 %v431_v1, %v220_v35  ;;  %v156_v42 = vstv %s542_s4 }
  0x44   :  { %v101_v29 = vadd.f32 %v100_v22, %v82_v21  ;;  %v119_v33 = vmul.f32 %v322_v28, %v118_v9  ;;  %329 = vtanh.f32 %v191_v30  ;;  %v225_v39 = vmul.f32 %v436_v2, %v224_v36  ;;  %v324_v40 = vpop.eup %323 }
  0x45   :  { %v236_v43 = vstv %s550_s23  ;;  %v239_v44 = vstv %s552_s24  ;;  %v138_v45 = vmul.f32 %v324_v40, %v137_v25  ;;  %v210_v46 = vadd.f32 %v209_v34, %v207_v37 }
  0x46   :  { %v120_v41 = vadd.f32 %v119_v33, %v101_v29  ;;  %v222_v47 = vadd.f32 %v221_v38, %v218_v32  ;;  %v237_v48 = vmul.f32 %v236_v43, %v426_v0  ;;  %v228_v49 = vstv %s558_s25 }
  0x47   :  { %v240_v50 = vmul.f32 %v431_v1, %v239_v44  ;;  %v243_v51 = vstv %s560_s26  ;;  %331 = vtanh.f32 %v210_v46  ;;  %v175_v57 = vstv %s568_s27 }
  0x48   :  { %v326_v52 = vpop.eup %325  ;;  %v139_v53 = vadd.f32 %v138_v45, %v120_v41  ;;  %v226_v54 = vadd.f32 %v225_v39, %v222_v47  ;;  %v244_v55 = vmul.f32 %v436_v2, %v243_v51  ;;  %v247_v60 = vstv %s573_s3 }
  0x49   :  { %v157_v56 = vmul.f32 %v326_v52, %v156_v42  ;;  %v241_v58 = vadd.f32 %v240_v50, %v237_v48  ;;  %v194_v3 = vstv %s578_s28  ;;  %v213_v7 = vstv %s303_s29 }
  0x4a   :  { %v229_v59 = vadd.f32 %v228_v49, %v226_v54  ;;  %v232_v10 = vstv %s308_s30  ;;  %v251_v14 = vstv %s313_s6 }
  0x4b   :  { %v328_v61 = vpop.eup %327  ;;  %v158_v62 = vadd.f32 %v157_v56, %v139_v53  ;;  %v245_v0 = vadd.f32 %v244_v55, %v241_v58 }
  0x4c   :  { %v176_v63 = vmul.f32 %v328_v61, %v175_v57  ;;  %333 = vtanh.f32 %v229_v59 }
  0x4d   :  { %v248_v1 = vadd.f32 %v247_v60, %v245_v0 }
  0x4e   :  { %v330_v4 = vpop.eup %329  ;;  %v177_v5 = vadd.f32 %v176_v63, %v158_v62 }
  0x4f   :  { %v195_v6 = vmul.f32 %v330_v4, %v194_v3  ;;  %335 = vtanh.f32 %v248_v1 }
  0x51   :  { %v196_v2 = vadd.f32 %v195_v6, %v177_v5  ;;  %v332_v8 = vpop.eup %331 }
  0x52   :  { %v214_v9 = vmul.f32 %v332_v8, %v213_v7 }
  0x54   :  { %v215_v11 = vadd.f32 %v214_v9, %v196_v2 }
  0x56   :  { %v334_v12 = vpop.eup %333 }
  0x57   :  { %v233_v13 = vmul.f32 %v334_v12, %v232_v10 }
  0x59   :  { %v336_v15 = vpop.eup %335  ;;  %v234_v16 = vadd.f32 %v233_v13, %v215_v11 }
  0x5a   :  { %v252_v17 = vmul.f32 %v336_v15, %v251_v14 }
  0x5c   :  { %v253_v18 = vadd.f32 %v252_v17, %v234_v16 }
  0x5e   :  { %v254_v19 = vmul.f32 0.5, %v253_v18 }
  0x60   :  { %337 = vtanh.f32 %v254_v19 }
  0x6a   :  { %v338_v20 = vpop.eup %337 }
  0x6b   :  { %v256_v21 = vmul.f32 0.5, %v338_v20 }
  0x6d   :  { %v257_v22 = vadd.f32 0.5, %v256_v21 }
  0x6f   :  { %258 = vst [vmem:[%s601_s5] sm:$0xff] %v257_v22 }
  0x70   :  { %263 = vsyncpa [#allocation4], 1 }
  0x71   :  { %264 = vsyncpa [#allocation6], 1 }

</bundles_post_ra>
